<compile_context>
chip_gen: v6e
topology: v6e:2x2x1
jax: 0.10.0
libtpu: 0.0.40
codegen_flags: <defaults>
</compile_context>

<pallas_src>
import jax
import jax.numpy as jnp
from jax.experimental import pallas as pl
from jax.experimental.pallas import tpu as pltpu

TAU = 2.0        # LIF time constant
V_TH = 1.0       # LIF threshold (spikingjelly default)
BN_EPS = 1e-5    # BatchNorm2d default eps
LANE = 128       # TPU lane width


def _round_up(x, m):
    return (x + m - 1) // m * m


def _physical_vmem_bytes():
    """Per-TC VMEM capacity; conservative fallback if the query is unavailable."""
    try:
        return int(pltpu.get_tpu_info().vmem_capacity_bytes)
    except Exception:
        return 64 << 20  # v7x per-TC VMEM (smallest current generation)


def _vmem_estimate(Cin, Chid, Cout, tile_hw, in_isz, w_isz, out_isz):
    """Rough per-step VMEM working set for one (b, hw-tile, t) grid step."""
    x_blk = 2 * Cin * tile_hw * in_isz           # double-buffered input tile
    o_blk = 2 * Cout * tile_hw * out_isz         # double-buffered output tile
    wts = (Chid * Cin + Cout * Chid) * w_isz     # single-buffered weights
    bias = (_round_up(Chid, 8) + _round_up(Cout, 8)) * LANE * 4
    v_scr = Chid * tile_hw * 4                   # LIF membrane scratch (f32)
    tmps = 3 * Chid * tile_hw * 4                # h1 / h / spike live f32 values
    return x_blk + o_blk + wts + bias + v_scr + tmps


def _pick_tile_hw(HW, B, Cin, Chid, Cout, in_isz, w_isz, out_isz, budget_bytes):
    """Largest lane-multiple H*W tile that fits the VMEM budget."""
    if HW <= LANE:
        return HW                                 # full-extent block is allowed
    tile = min(4096, (HW // LANE) * LANE)
    while tile > LANE and _vmem_estimate(
            Cin, Chid, Cout, tile, in_isz, w_isz, out_isz) > budget_bytes:
        tile -= LANE
    # v7x megacore: make sure the parallel axes expose >= 2 units of work.
    if B * (-(-HW // tile)) < 2 and tile > LANE:
        tile = max(LANE, _round_up(tile // 2, LANE))
    return tile


def mlp_lif_kernel(x_ref, w1_ref, b1_ref, w2_ref, b2_ref, o_ref, v_ref):
    # grid = (batch b [parallel], hw-tile j [parallel], time-step t [arbitrary]).
    # v_ref holds the LIF membrane of this (b, j) tile, carried across the
    # innermost sequential t axis.  INVARIANT: T stays the last grid axis.
    t = pl.program_id(2)

    # fc1 (1x1 conv == channel contraction); eval-mode BN pre-folded into w1/b1.
    # Tokens (H*W) are on the lane axis, channels on the contraction axis.
    x = x_ref[...].astype(w1_ref.dtype)                                   # (Cin, thw)
    h1 = jnp.dot(w1_ref[...], x, preferred_element_type=jnp.float32)      # (Chid, thw)
    h1 = h1 + b1_ref[...]                                                 # bias bcast over lanes

    # LIF charge (decay_input=True, v_reset=0).  At t==0 the membrane starts at
    # zero, so the charge is just h1/tau; the scalar select avoids a zero-fill
    # store + reload of v_ref (stale scratch is never selected).
    v = v_ref[...]
    h = jnp.where(t == 0, h1 * (1.0 / TAU), v + (h1 - v) * (1.0 / TAU))
    fired = h >= V_TH
    spike = fired.astype(w2_ref.dtype)          # exact 0/1 -> lossless cast
    v_ref[...] = jnp.where(fired, 0.0, h)       # hard reset via select

    # fc2 (1x1 conv) + bias.  Dropout has p=0.0 (module default) -> identity.
    out = jnp.dot(w2_ref[...], spike, preferred_element_type=jnp.float32)  # (Cout, thw)
    o_ref[...] = (out + b2_ref[...]).astype(o_ref.dtype)


def mlp_forward(x_nchw, params, T, *, tile_hw=None,
                compute_dtype=jnp.bfloat16, out_dtype=None):
    """Fused fc1(1x1 conv) -> BN2d(eval) -> MultiStepLIF -> fc2(1x1 conv).

    compute_dtype is the MXU operand dtype (accumulation is always float32);
    out_dtype defaults to compute_dtype (bf16 output halves writeback traffic).
    Use compute_dtype=float32 for bit-faithful checking against the reference.
    """
    TB, Cin, H, W = x_nchw.shape
    assert TB % T == 0
    B = TB // T
    HW = H * W
    Chid = params["w1"].shape[0]
    Cout = params["w2"].shape[0]
    out_dtype = compute_dtype if out_dtype is None else out_dtype

    # NCHW -> (T, B, Cin, H*W): pure reshape (no permutation) -> free in XLA.
    x_r = x_nchw.reshape(T, B, Cin, HW)

    # Fold eval-mode BN into fc1:  w1' = w1 * scale,  b1' = b1 * scale + shift.
    scale = params["bn_gamma"] / jnp.sqrt(params["bn_var"] + BN_EPS)
    shift = params["bn_beta"] - params["bn_mean"] * scale
    w1_eff = (params["w1"] * scale[:, None]).astype(compute_dtype)      # (Chid, Cin)
    b1_eff = (params["b1"] * scale + shift).reshape(Chid, 1).astype(jnp.float32)
    w2 = params["w2"].astype(compute_dtype)                             # (Cout, Chid)
    b2 = params["b2"].reshape(Cout, 1).astype(jnp.float32)

    in_isz = x_nchw.dtype.itemsize
    w_isz = jnp.dtype(compute_dtype).itemsize
    out_isz = jnp.dtype(out_dtype).itemsize

    phys_vmem = _physical_vmem_bytes()
    budget = max(16 << 20, (2 * phys_vmem) // 5)   # ~40% of per-TC VMEM for working set
    if tile_hw is None:
        tile_hw = _pick_tile_hw(HW, B, Cin, Chid, Cout, in_isz, w_isz, out_isz, budget)

    vmem_limit = _vmem_estimate(Cin, Chid, Cout, tile_hw, in_isz, w_isz, out_isz) + (12 << 20)
    vmem_limit = max(vmem_limit, 32 << 20)
    vmem_limit = min(vmem_limit, max(phys_vmem - (16 << 20), 32 << 20))

    n_hw = pl.cdiv(HW, tile_hw)          # partial edge tile handled by masked stores
    grid = (B, n_hw, T)                  # parallel, parallel, sequential (LIF carry)

    const = pl.Buffered(1)               # weights/biases never re-fetched -> single buffer
    out = pl.pallas_call(
        mlp_lif_kernel,
        out_shape=jax.ShapeDtypeStruct((T, B, Cout, HW), out_dtype),
        grid_spec=pltpu.PrefetchScalarGridSpec(
            num_scalar_prefetch=0,
            grid=grid,
            in_specs=[
                pl.BlockSpec((None, None, Cin, tile_hw),
                             lambda b, j, t: (t, b, 0, j)),                     # x (NCHW tokens)
                pl.BlockSpec((Chid, Cin), lambda b, j, t: (0, 0),
                             pipeline_mode=const),                              # fc1+BN weight
                pl.BlockSpec((Chid, 1), lambda b, j, t: (0, 0),
                             pipeline_mode=const),                              # fc1+BN bias
                pl.BlockSpec((Cout, Chid), lambda b, j, t: (0, 0),
                             pipeline_mode=const),                              # fc2 weight
                pl.BlockSpec((Cout, 1), lambda b, j, t: (0, 0),
                             pipeline_mode=const),                              # fc2 bias
            ],
            out_specs=pl.BlockSpec((None, None, Cout, tile_hw),
                                   lambda b, j, t: (t, b, 0, j)),
            scratch_shapes=[pltpu.VMEM((Chid, tile_hw), jnp.float32)],          # LIF membrane
        ),
        compiler_params=pltpu.CompilerParams(
            # b and j are embarrassingly parallel (megacore-shardable); T must
            # stay "arbitrary"/innermost: the LIF recurrence lives in scratch.
            dimension_semantics=("parallel", "parallel", "arbitrary"),
            vmem_limit_bytes=int(vmem_limit),
        ),
    )(x_r, w1_eff, b1_eff, w2, b2)

    # (T, B, Cout, H*W) -> (T*B, Cout, H, W): pure reshape, free.
    return out.reshape(TB, Cout, H, W)


def ref_forward(x_nchw, params, T):
    """Pure-JAX reference matching the PyTorch forward (eval-mode BN, p=0 dropout)."""
    TB, Cin, H, W = x_nchw.shape
    h1 = jnp.einsum("nchw,oc->nohw", x_nchw, params["w1"]) \
        + params["b1"][None, :, None, None]
    scale = params["bn_gamma"] / jnp.sqrt(params["bn_var"] + BN_EPS)
    shift = params["bn_beta"] - params["bn_mean"] * scale
    h1 = h1 * scale[None, :, None, None] + shift[None, :, None, None]

    Chid = params["w1"].shape[0]
    h1 = h1.reshape(T, TB // T, Chid, H, W)
    v = jnp.zeros_like(h1[0])
    spikes = []
    for t in range(T):
        h = v + (h1[t] - v) / TAU
        s = (h >= V_TH).astype(jnp.float32)
        v = h * (1.0 - s)
        spikes.append(s)
    s = jnp.stack(spikes, 0).reshape(TB, Chid, H, W)
    out = jnp.einsum("nchw,oc->nohw", s, params["w2"]) \
        + params["b2"][None, :, None, None]
    return out


if __name__ == "__main__":
    T, B, Cin, Chid, Cout, H, W = 2, 2, 4, 16, 4, 16, 16

    key = jax.random.PRNGKey(0)
    ks = jax.random.split(key, 9)
    params = {
        "w1": 0.5 * jax.random.normal(ks[0], (Chid, Cin), jnp.float32),
        "b1": 0.1 * jax.random.normal(ks[1], (Chid,), jnp.float32),
        "bn_gamma": 1.0 + 0.1 * jax.random.normal(ks[2], (Chid,), jnp.float32),
        "bn_beta": 0.1 * jax.random.normal(ks[3], (Chid,), jnp.float32),
        "bn_mean": 0.1 * jax.random.normal(ks[4], (Chid,), jnp.float32),
        "bn_var": jnp.abs(jax.random.normal(ks[5], (Chid,), jnp.float32)) + 0.5,
        "w2": 0.5 * jax.random.normal(ks[6], (Cout, Chid), jnp.float32),
        "b2": 0.1 * jax.random.normal(ks[7], (Cout,), jnp.float32),
    }
    x = jax.random.normal(ks[8], (T * B, Cin, H, W), jnp.float32)

    # 1) f32-operand/f32-output path: verify against the PyTorch-faithful reference.
    out_f32 = jax.block_until_ready(
        mlp_forward(x, params, T, compute_dtype=jnp.float32))
    ref = ref_forward(x, params, T)
    assert out_f32.shape == (T * B, Cout, H, W)
    max_err = float(jnp.max(jnp.abs(out_f32 - ref)))
    assert jnp.allclose(out_f32, ref, atol=2e-4, rtol=2e-4), f"max_err={max_err}"

    # 2) bf16-operand, bf16-output path (performance default): run and sanity-check.
    #    (Bitwise equality with the f32 reference is not expected: the hard LIF
    #     threshold may flip for values sitting exactly at V_TH under bf16 operands.)
    out_bf16 = jax.block_until_ready(mlp_forward(x, params, T))
    assert out_bf16.shape == (T * B, Cout, H, W)
    assert out_bf16.dtype == jnp.bfloat16
    assert bool(jnp.all(jnp.isfinite(out_bf16.astype(jnp.float32))))

    print("KERNEL_OK")
</pallas_src>

<mosaic_0001>
module attributes {stable_mosaic.version = 11 : i64} {
  func.func @mlp_lif_kernel(%arg0: i32, %arg1: i32, %arg2: i32, %arg3: memref<1x1x4x256xf32, #tpu.memory_space<vmem>>, %arg4: memref<16x4xf32, #tpu.memory_space<vmem>>, %arg5: memref<16x1xf32, #tpu.memory_space<vmem>>, %arg6: memref<4x16xf32, #tpu.memory_space<vmem>>, %arg7: memref<4x1xf32, #tpu.memory_space<vmem>>, %arg8: memref<1x1x4x256xf32, #tpu.memory_space<vmem>>, %arg9: memref<16x256xf32, #tpu.memory_space<vmem>>) attributes {dimension_semantics = [#tpu.dimension_semantics<parallel>, #tpu.dimension_semantics<parallel>, #tpu.dimension_semantics<arbitrary>], iteration_bounds = array<i64: 2, 1, 2>, scalar_prefetch = 0 : i64, scratch_operands = 1 : i64, tpu.core_type = #tpu.core_type<tc>, window_params = [{transform_indices = @transform_0, window_bounds = array<i64: 1, 1, 4, 256>}, {pipeline_mode = #tpu.pipeline_mode<synchronous>, transform_indices = @transform_1, window_bounds = array<i64: 16, 4>}, {pipeline_mode = #tpu.pipeline_mode<synchronous>, transform_indices = @transform_2, window_bounds = array<i64: 16, 1>}, {pipeline_mode = #tpu.pipeline_mode<synchronous>, transform_indices = @transform_3, window_bounds = array<i64: 4, 16>}, {pipeline_mode = #tpu.pipeline_mode<synchronous>, transform_indices = @transform_4, window_bounds = array<i64: 4, 1>}, {transform_indices = @transform_5, window_bounds = array<i64: 1, 1, 4, 256>}]} {
    %c0 = arith.constant 0 : index
    %c0_0 = arith.constant 0 : index
    %c0_1 = arith.constant 0 : index
    %c0_2 = arith.constant 0 : index
    %0 = vector.load %arg3[%c0, %c0_0, %c0_1, %c0_2] : memref<1x1x4x256xf32, #tpu.memory_space<vmem>>, vector<1x1x4x256xf32>
    %1 = vector.shape_cast %0 : vector<1x1x4x256xf32> to vector<4x256xf32>
    %c0_3 = arith.constant 0 : index
    %c0_4 = arith.constant 0 : index
    %2 = vector.load %arg4[%c0_3, %c0_4] : memref<16x4xf32, #tpu.memory_space<vmem>>, vector<16x4xf32>
    %cst = arith.constant dense<0.000000e+00> : vector<16x256xf32>
    %3 = tpu.matmul %2, %1, %cst {dimension_numbers = #tpu.dot_dimension_numbers<[1], [0], [0], [1], [0, 0, 1, 1], [], []>} : vector<16x4xf32>, vector<4x256xf32>, vector<16x256xf32> -> vector<16x256xf32>
    %c0_5 = arith.constant 0 : index
    %c0_6 = arith.constant 0 : index
    %4 = vector.load %arg5[%c0_5, %c0_6] : memref<16x1xf32, #tpu.memory_space<vmem>>, vector<16x1xf32>
    %5 = vector.broadcast %4 : vector<16x1xf32> to vector<16x256xf32>
    %6 = arith.addf %3, %5 : vector<16x256xf32>
    %c0_7 = arith.constant 0 : index
    %c0_8 = arith.constant 0 : index
    %7 = vector.load %arg9[%c0_7, %c0_8] : memref<16x256xf32, #tpu.memory_space<vmem>>, vector<16x256xf32>
    %c0_i32 = arith.constant 0 : i32
    %8 = arith.cmpi eq, %arg2, %c0_i32 : i32
    %cst_9 = arith.constant 5.000000e-01 : f32
    %9 = vector.broadcast %cst_9 : f32 to vector<16x256xf32>
    %10 = arith.mulf %6, %9 : vector<16x256xf32>
    %11 = arith.subf %6, %7 : vector<16x256xf32>
    %cst_10 = arith.constant 5.000000e-01 : f32
    %12 = vector.broadcast %cst_10 : f32 to vector<16x256xf32>
    %13 = arith.mulf %11, %12 : vector<16x256xf32>
    %14 = arith.addf %7, %13 : vector<16x256xf32>
    %15 = arith.select %8, %10, %14 : vector<16x256xf32>
    %cst_11 = arith.constant 1.000000e+00 : f32
    %16 = vector.broadcast %cst_11 : f32 to vector<16x256xf32>
    %17 = arith.cmpf oge, %15, %16 : vector<16x256xf32>
    %18 = arith.extui %17 : vector<16x256xi1> to vector<16x256xi32>
    %19 = arith.sitofp %18 : vector<16x256xi32> to vector<16x256xf32>
    %cst_12 = arith.constant 0.000000e+00 : f32
    %20 = vector.broadcast %cst_12 : f32 to vector<16x256xf32>
    %21 = arith.select %17, %20, %15 : vector<16x256xi1>, vector<16x256xf32>
    %c0_13 = arith.constant 0 : index
    %c0_14 = arith.constant 0 : index
    %22 = vector.load %arg9[%c0_13, %c0_14] : memref<16x256xf32, #tpu.memory_space<vmem>>, vector<16x256xf32>
    tpu.vector_store %arg9[%c0_13, %c0_14], %21 {strides = array<i32>} : memref<16x256xf32, #tpu.memory_space<vmem>>, vector<16x256xf32>,
    %c0_15 = arith.constant 0 : index
    %c0_16 = arith.constant 0 : index
    %23 = vector.load %arg6[%c0_15, %c0_16] : memref<4x16xf32, #tpu.memory_space<vmem>>, vector<4x16xf32>
    %cst_17 = arith.constant dense<0.000000e+00> : vector<4x256xf32>
    %24 = tpu.matmul %23, %19, %cst_17 {dimension_numbers = #tpu.dot_dimension_numbers<[1], [0], [0], [1], [0, 0, 1, 1], [], []>} : vector<4x16xf32>, vector<16x256xf32>, vector<4x256xf32> -> vector<4x256xf32>
    %c0_18 = arith.constant 0 : index
    %c0_19 = arith.constant 0 : index
    %25 = vector.load %arg7[%c0_18, %c0_19] : memref<4x1xf32, #tpu.memory_space<vmem>>, vector<4x1xf32>
    %26 = vector.broadcast %25 : vector<4x1xf32> to vector<4x256xf32>
    %27 = arith.addf %24, %26 : vector<4x256xf32>
    %c0_20 = arith.constant 0 : index
    %c0_21 = arith.constant 0 : index
    %c0_22 = arith.constant 0 : index
    %c0_23 = arith.constant 0 : index
    %28 = vector.load %arg8[%c0_20, %c0_21, %c0_22, %c0_23] : memref<1x1x4x256xf32, #tpu.memory_space<vmem>>, vector<1x1x4x256xf32>
    %29 = vector.shape_cast %28 : vector<1x1x4x256xf32> to vector<4x256xf32>
    %30 = vector.shape_cast %27 : vector<4x256xf32> to vector<1x1x4x256xf32>
    tpu.vector_store %arg8[%c0_20, %c0_21, %c0_22, %c0_23], %30 {strides = array<i32>} : memref<1x1x4x256xf32, #tpu.memory_space<vmem>>, vector<1x1x4x256xf32>,
    return
  }
  func.func @transform_0(%arg0: i32, %arg1: i32, %arg2: i32) -> (i32, i32, i32, i32) {
    %c0_i32 = arith.constant 0 : i32
    %c0_i32_0 = arith.constant 0 : i32
    return %arg2, %arg0, %c0_i32, %arg1 : i32, i32, i32, i32
  }
  func.func @transform_1(%arg0: i32, %arg1: i32, %arg2: i32) -> (i32, i32) {
    %c0_i32 = arith.constant 0 : i32
    %c0_i32_0 = arith.constant 0 : i32
    %c0_i32_1 = arith.constant 0 : i32
    return %c0_i32, %c0_i32_0 : i32, i32
  }
  func.func @transform_2(%arg0: i32, %arg1: i32, %arg2: i32) -> (i32, i32) {
    %c0_i32 = arith.constant 0 : i32
    %c0_i32_0 = arith.constant 0 : i32
    %c0_i32_1 = arith.constant 0 : i32
    return %c0_i32, %c0_i32_0 : i32, i32
  }
  func.func @transform_3(%arg0: i32, %arg1: i32, %arg2: i32) -> (i32, i32) {
    %c0_i32 = arith.constant 0 : i32
    %c0_i32_0 = arith.constant 0 : i32
    %c0_i32_1 = arith.constant 0 : i32
    return %c0_i32, %c0_i32_0 : i32, i32
  }
  func.func @transform_4(%arg0: i32, %arg1: i32, %arg2: i32) -> (i32, i32) {
    %c0_i32 = arith.constant 0 : i32
    %c0_i32_0 = arith.constant 0 : i32
    %c0_i32_1 = arith.constant 0 : i32
    return %c0_i32, %c0_i32_0 : i32, i32
  }
  func.func @transform_5(%arg0: i32, %arg1: i32, %arg2: i32) -> (i32, i32, i32, i32) {
    %c0_i32 = arith.constant 0 : i32
    %c0_i32_0 = arith.constant 0 : i32
    return %arg2, %arg0, %c0_i32, %arg1 : i32, i32, i32, i32
  }
}

</mosaic_0001>

<bundles_post_ra>
// kernel: tpu_custom_call.1
= control target key start
LH: loop header
LB: loop body
LE: loop exit
PB: predicated region body
PF: predicated region fallthrough
CT: control target
= control target key end

     0   :  { %10 = vsyncpa [#allocation4], 0  ;;  %s1019_s0 = inlined_call_operand.vmem [shape: f32[2,2,4,256], index: 0, kind: input, shape index: {}]   ;;  %s1020_s1 = inlined_call_operand.vmem [shape: f32[16,4], index: 1, kind: input, shape index: {}]   ;;  %s1021_s2 = inlined_call_operand.vmem [shape: f32[16,1], index: 2, kind: input, shape index: {}]   ;;  %s1022_s3 = inlined_call_operand.vmem [shape: f32[4,16], index: 3, kind: input, shape index: {}]   ;;  %s1023_s4 = inlined_call_operand.vmem [shape: f32[4,1], index: 4, kind: input, shape index: {}]   ;;  %s1024_s5 = inlined_call_operand.hbm [shape: f32[2,2,4,256], index: 5, kind: output, shape index: {}]  }
   0x1   :  { %12 = vsyncpa [#allocation4 + $0x1], 0  ;;  %s860_s18 = smov 0   ;;  %s862_s19 = smov 0  }
   0x2   :  { %s864_s20 = smov 0   ;;  %s866_s21 = smov 0  }
   0x3   :  { %s868_s22 = smov 0   ;;  %s870_s23 = smov 0  }
   0x4   :  { %s872_s24 = smov 0   ;;  %s874_s25 = smov 0  }
   0x5 LB: > { %s627_s26 = sadd.s32 4294967295, %s824_s25   ;;  %s628_s27 = sadd.s32 4294967294, %s824_s25   ;;  %s824_s25 = sphi %s874_s25, %s18_s25   ;;  %s820_s24 = sphi %s872_s24, %s1038_s24   ;;  %s816_s23 = sphi %s870_s23, %s1037_s23   ;;  %s812_s22 = sphi %s868_s22, %s1036_s22   ;;  %s808_s21 = sphi %s866_s21, %s1035_s21   ;;  %s804_s20 = sphi %s864_s20, %s1034_s20   ;;  %s800_s19 = sphi %s862_s19, %s1033_s19   ;;  %s796_s18 = sphi %s860_s18, %s1032_s18  }
   0x6   : > { %s30_s28 = sadd.s32 1, %s816_s23  ;;  %s37_s29 = sadd.s32 1, %s820_s24 }
   0x7   : > { %p31_p0 = scmp.ge.s32.totalorder %s30_s28, 2  ;;  %p172_p1 = scmp.ne.s32.totalorder %s804_s20, %s800_s19 }
   0x8   : > { %p173_p2 = scmp.eq.s32.totalorder %s627_s26, 3  ;;  %p178_p5 = scmp.ne.s32.totalorder %s800_s19, %s796_s18 }
   0x9   : > { %s1040_s28 = smov (%p31_p0, %s30_s28), 0  ;;  %s1042_s29 = smov (!%p31_p0, %s37_s29), %s820_s24 }
   0xa   : > { %s155_s30 = ssub.s32 %s816_s23, %s1040_s28  ;;  %p911_p3 = por %p173_p2, %p172_p1 }
   0xb   : > { %p39_p4 = scmp.ge.s32.totalorder %s1042_s29, 2  ;;  %p179_p6 = scmp.eq.s32.totalorder %s628_s27, 3 }
   0xc   : > { %p631_p7 = scmp.ge.s32.totalorder %s824_s25, 1  ;;  %p226_p9 = scmp.lt.s32.totalorder %s824_s25, 5 }
   0xd   : > { %s1044_s29 = smov (%p39_p4, %s1042_s29), 0  ;;  %p920_p8 = por %p179_p6, %p178_p5 }
   0xe   : > { %1027 = sst [smem:[#allocation6_spill]] %s1044_s29  ;;  %s156_s8 = ssub.s32 %s820_s24, %s1044_s29 }
   0xf   : > { %s162_s9 = sadd.s32 1, %s804_s20  ;;  %s157_s10 = sor.u32 %s156_s8, %s155_s30 }
  0x10   : > { %p227_p10 = pnand %p631_p7, %p226_p9  ;;  %p160_p11 = scmp.eq.s32.totalorder %s157_s10, 0 }
  0x11   : > { %p263_p12 = scmp.lt.s32.totalorder (!%p227_p10), %s808_s21, 1  ;;  %p265_p13 = scmp.lt.s32.totalorder (!%p227_p10), %s812_s22, 1 }
  0x12   : > { %s929_s11 = scalar_select %p160_p11, %s804_s20, %s162_s9  }
  0x13   : > { %230 = sbr.rel (%p227_p10) target bundleno = 461 (0x1cd), region = 40  ;;  %p387_p0 = scmp.eq.s32.totalorder (!%p227_p10), %s808_s21, 0 }
  0x14   : > { %s650_s9 = sshll.u32 (!%p227_p10), %s812_s22, 1  ;;  %s651_s10 = sshll.u32 (!%p227_p10), %s808_s21, 2 }
  0x18   : > { %v826_v0 = vmov 0.0   ;;  %v281_v1 = vld [vmem:[%s1021_s2 + $0x8] sm:$0xff]  ;;  %s264_s14 = scalar_select %p263_p12, %s808_s21, 1  ;;  %v827_v2 = vmov 0   ;;  %v280_v3 = vld [vmem:[%s1021_s2] sm:$0xff]  ;;  %vm301_vm0 = vcmask 1043456  }
  0x19   : > { %370 = vmatprep.mubr.f32.mxu0 %v826_v0  ;;  %506 = vmatprep.mubr.f32.mxu1 %v826_v0  ;;  %s266_s15 = scalar_select %p265_p13, %s812_s22, 1  ;;  %v278_v6 = vld [vmem:[%s1020_s1] sm:$0xff]  ;;  %vm294_vm1 = vcmask 31744   ;;  %v279_v7 = vld [vmem:[%s1020_s1 + $0x8] sm:$0xff]  ;;  %v383_v12 = vld [vmem:[#allocation2 + $0x10] sm:$0xff]  ;;  %v828_v49 = vmov 1.0  }
  0x1a   : > { %729 = vset.pattern.permute.xlu0 %v827_v2  ;;  %730 = vset.pattern.permute.xlu1 %v827_v2  ;;  %s634_s16 = sshll.u32 %s264_s14, 2  ;;  %v432_v8 = vld [vmem:[%s1023_s4] sm:$0xf]  ;;  %v385_v20 = vld [vmem:[#allocation2 + $0x18] sm:$0xff]  ;;  %v386_v30 = vld [vmem:[#allocation2 + $0x8] sm:$0xff]  ;;  %vm438_vm7 = vcmask 130048  }
  0x1b   : > { %289 = vperm.xlu0 %729, %v281_v1   ;;  %s633_s27 = sshll.u32 %s266_s15, 1  ;;  %435 = vperm.xlu1 %730, %v432_v8   ;;  %v384_v15 = vld [vmem:[#allocation2] sm:$0xff]  ;;  %s829_s21 = smov [#allocation3]  }
  0x1c   : > { %s272_s30 = sadd.s32 %s634_s16, %s633_s27  ;;  %v431_v50 = vld [vmem:[%s1022_s3] sm:$0xf]  ;;  %s736_s27 = sshll.u32 %s829_s21, 4  ;;  %s737_s27 = int_to_ptr.vmem [resolvable:$false] %s736_s27 }
  0x1d   : > { %s635_s8 = sshll.u32 %s272_s30, 2  ;;  %s259_s30 = sand.u32 1, %s800_s19  }
  0x1e   : > { %s274_s12 = scalar_lea.vmem %s1019_s0, %s635_s8  ;;  %s632_s8 = sshll.u32 %s259_s30, 3 }
  0x1f   : > { %284 = vperm.xlu0 %729, %v280_v3   ;;  %v277_v4 = vld [vmem:[%s274_s12] sm:$0xff]  ;;  %s404_s29 = scalar_select %p387_p0, 1, 0 }
  0x20   : > { %v293_v5 = vcombine.high %v277_v4, %v277_v4  ;;  %s533_s12 = sadd.s32 %s651_s10, %s650_s9  ;;  %s261_s14 = scalar_lea.vmem [#allocation3], %s632_s8 }
  0x21   : > { %v405_v18 = vstv %s404_s29  ;;  %s652_s13 = sshll.u32 %s533_s12, 6  ;;  %s537_s15 = sshll.u32 %s261_s14, 4  ;;  %s538_s15 = int_to_ptr.vmem [resolvable:$true] %s537_s15 }
  0x22   : > { %636 = vmatprep.subr.msk.mxu0 %vm301_vm0, %v293_v5  ;;  %vm954_vm2 = vcmp.eq.s32.totalorder %v405_v18, 1  ;;  %s535_s29 = scalar_lea.hbm %s1024_s5, %s652_s13  ;;  %s519_s26 = scalar_lea.sflag [#allocation4], %s259_s30 }
  0x23   : > { %637 = vmatpush1.msk.msra.mxu0 %vm301_vm0, %v277_v4  ;;  %s732_s22 = scalar_lea.vmem %s538_s15, 128  ;;  %s738_s8 = scalar_lea.vmem %s737_s27, 256 }
  0x24   : > { %638 = vmatmul.mubr.msk.f32.vlgmr.msra.gmra.mxu0 %vm294_vm1, %v278_v6  ;;  %p733_p1 = scmp.ne.s32.totalorder %s538_s15, %s732_s22  ;;  %p739_p5 = scmp.lt.s32.totalorder %s538_s15, %s737_s27 }
  0x25   : > { %376 = vmatprep.mubr.f32.mxu0 %v826_v0  ;;  %p740_p6 = scmp.lt.s32.totalorder %s738_s8, %s732_s22 }
  0x26   : > { %p734_p2 = pnand %p733_p1, %p911_p3 }
  0x27   : > { %p741_p7 = por %p740_p6, %p739_p5 }
  0x28   : > { %639 = vmatmul.mubr.msk.f32.gmra.mxu0 %vm294_vm1, %v279_v7  ;;  %p735_p4 = pneg %p734_p2 }
  0x2a   : > { %p742_p9 = pnand %p741_p7, %p735_p4 }
  0x96   : > { %v290_v9 = vpop.permute.xlu0 %289  ;;  %v436_v51 = vpop.permute.xlu1 %435 }
  0x9a   : > { %v285_v10 = vpop.permute.xlu0 %284 }
  0xe4   : > { %v372_v11 = vpop.f32.mrf.mxu0 }
  0xe5   : > { %v373_v13 = vadd.f32 %v372_v11, %v285_v10 }
  0xe6   : > { %v374_v14 = vpop.f32.mrf.mxu0 }
  0xe7   : > { %v392_v16 = vsub.f32 %v373_v13, %v383_v12  ;;  %v375_v17 = vadd.f32 %v374_v14, %v285_v10  ;;  %v388_v26 = vmul.f32 0.5, %v373_v13 }
  0xe8   : > { %v378_v19 = vpop.f32.mrf.mxu0 }
  0xe9   : > { %v396_v21 = vmul.f32 0.5, %v392_v16  ;;  %v393_v22 = vsub.f32 %v375_v17, %v384_v15  ;;  %v379_v23 = vadd.f32 %v378_v19, %v290_v9  ;;  %v389_v32 = vmul.f32 0.5, %v375_v17 }
  0xea   : > { %v380_v24 = vpop.f32.mrf.mxu0 }
  0xeb   : > { %v400_v27 = vadd.f32 %v396_v21, %v383_v12  ;;  %v397_v28 = vmul.f32 0.5, %v393_v22  ;;  %v394_v29 = vsub.f32 %v379_v23, %v385_v20  ;;  %v381_v31 = vadd.f32 %v380_v24, %v290_v9 }
  0xec   : > { %v390_v37 = vmul.f32 0.5, %v379_v23 }
  0xed   : > { %v401_v33 = vadd.f32 %v397_v28, %v384_v15  ;;  %v398_v34 = vmul.f32 0.5, %v394_v29  ;;  %v407_v35 = vsel %vm954_vm2, %v388_v26, %v400_v27  ;;  %v395_v36 = vsub.f32 %v381_v31, %v386_v30 }
  0xee   : > { %vm411_vm3 = vcmp.ge.f32.partialorder %v407_v35, 1.0  ;;  %v391_v44 = vmul.f32 0.5, %v381_v31 }
  0xef   : > { %v402_v38 = vadd.f32 %v398_v34, %v385_v20  ;;  %v408_v39 = vsel %vm954_vm2, %v389_v32, %v401_v33  ;;  %v423_v40 = vsel %vm411_vm3, 0.0, %v407_v35  ;;  %v399_v41 = vmul.f32 0.5, %v395_v36 }
  0xf0   : > { %vm412_vm4 = vcmp.ge.f32.partialorder %v408_v39, 1.0  ;;  %427 = vst [vmem:[#allocation2 + $0x10] sm:$0xff] %v423_v40 }
  0xf1   : > { %v409_v42 = vsel %vm954_vm2, %v390_v37, %v402_v38  ;;  %v424_v43 = vsel %vm412_vm4, 0.0, %v408_v39  ;;  %v403_v45 = vadd.f32 %v399_v41, %v386_v30 }
  0xf2   : > { %vm413_vm5 = vcmp.ge.f32.partialorder %v409_v42, 1.0  ;;  %428 = vst [vmem:[#allocation2] sm:$0xff] %v424_v43 }
  0xf3   : > { %v425_v46 = vsel %vm413_vm5, 0.0, %v409_v42  ;;  %v410_v47 = vsel %vm954_vm2, %v391_v44, %v403_v45 }
  0xf4   : > { %429 = vst [vmem:[#allocation2 + $0x18] sm:$0xff] %v425_v46  ;;  %vm414_vm6 = vcmp.ge.f32.partialorder %v410_v47, 1.0 }
  0xf5   : > { %v426_v48 = vsel %vm414_vm6, 0.0, %v410_v47  ;;  %644 = vmatprep.subr.msk.mxu1 %vm414_vm6, %v828_v49 }
  0xf6   : > { %430 = vst [vmem:[#allocation2 + $0x8] sm:$0xff] %v426_v48  ;;  %645 = vmatpush1.msk.msra.mxu1 %vm413_vm5, %v828_v49 }
  0xf7   : > { %646 = vmatprep.subr.msk.mxu1 %vm412_vm4, %v828_v49 }
  0xf8   : > { %647 = vmatpush1.msk.msra.mxu1 %vm411_vm3, %v828_v49 }
  0xf9   : > { %648 = vmatmul.mubr.msk.f32.vlgmr.msra.gmra.mxu1 %vm438_vm7, %v431_v50 }
 0x1b9   : > { %v508_v52 = vpop.f32.mrf.mxu1 }
 0x1ba   : > { %v509_v54 = vadd.f32 %v508_v52, %v436_v51 }
 0x1bb   : > { %v510_v53 = vpop.f32.mrf.mxu1 }
 0x1bc   : > { %v511_v55 = vadd.f32 %v510_v53, %v436_v51 }
 0x1be   : > { %v515_v56 = vcombine.low %v509_v54, %v511_v55 }
 0x1c0   : > { %517 = vst [vmem:[%s261_s14] sm:$0xff] %v515_v56 }
 0x1c1   : > { %745 = shalt.err (!%p742_p9)
}
 0x1c2   : > { %s746_s9 = scalar_lea.hbm %s535_s29, 128  ;;  %s750_s12 = scalar_lea.hbm %s1024_s5, 512 }
 0x1c3   : > { %p747_p10 = scmp.ne.s32.totalorder %s535_s29, %s746_s9  ;;  %p751_p13 = scmp.lt.s32.totalorder %s535_s29, %s1024_s5 }
 0x1c4   : > { %p752_p0 = scmp.lt.s32.totalorder %s750_s12, %s746_s9 }
 0x1c5   : > { %p748_p11 = pnand %p747_p10, %p911_p3 }
 0x1c6   : > { %p753_p1 = por %p752_p0, %p751_p13 }
 0x1c7   : > { %p749_p12 = pneg %p748_p11 }
 0x1c9   : > { %p754_p2 = pnand %p753_p1, %p749_p12 }
 0x1cb   : > { %757 = shalt.err (!%p754_p2)
}
 0x1cc   : > { %655 = dma.vmem_to_hbm [thread:$0]  (%p911_p3), %s538_s15, 128, %s535_s29, %s519_s26  }
 0x1cd PF: > { %p661_p4 = scmp.ge.s32.totalorder %s824_s25, 2  ;;  %s549_s16 = sand.u32 1, %s796_s18  }
 0x1ce   : > { %s550_s17 = scalar_lea.sflag [#allocation4], %s549_s16 }
 0x1cf   : > { %p658_p5 = pnand %p661_p4, %p920_p8 }
 0x1d1   : > { %p659_p6 = pneg %p658_p5 }
 0x1d3   : > { %791 = dma.done.wait (%p659_p6), %s550_s17, 128  }
 0x1d4   : > { %793 = vsyncadd (%p659_p6), %s550_s17, 4294967168  ;;  %s18_s25 = sadd.s32 1, %s824_s25   ;;  %s1031_s6 = sld [smem:[#allocation6_spill]] }
 0x1d5   : > { %p15_p7 = scmp.ge.s32.totalorder %s18_s25, 6   ;;  %s1032_s18 = smov %s800_s19 }
 0x1d6   : > { %s1033_s19 = smov %s804_s20  ;;  %s1034_s20 = smov %s929_s11 }
 0x1d7   : > { %s1035_s21 = smov %s816_s23  ;;  %s1036_s22 = smov %s820_s24 }
 0x1d8   : > { %s1037_s23 = smov %s1040_s28  ;;  %17 = sbr.rel (!%p15_p7) target bundleno = 5 (0x5), region = 75 }
 0x1da   : > { %s1038_s24 = smov %s1031_s6 }
 0x1dd   :  { %555 = vsyncpa [#allocation4], 1 }
 0x1de   :  { %557 = vsyncpa [#allocation4 + $0x1], 1 }

</bundles_post_ra>
